<compile_context>
chip_gen: v6e
topology: v6e:2x2x1
jax: 0.10.0
libtpu: 0.0.40
codegen_flags: <defaults>
</compile_context>

<pallas_src>
import jax
import jax.numpy as jnp
from jax.experimental import pallas as pl
from jax.experimental.pallas import tpu as pltpu


def _layernorm_f32(h, gamma, beta, eps=1e-5):
    mu = jnp.mean(h, axis=-1, keepdims=True)
    var = jnp.mean(h * h, axis=-1, keepdims=True) - mu * mu
    return (h - mu) * jax.lax.rsqrt(var + eps) * gamma + beta


def neuromod_kernel(x_ref, w1_ref, aux1_ref, w2_ref, aux2_ref, w3_ref, b3_ref,
                    o_ref):
    # x_ref block: (1, B, input_dim)  -> drop the leading instance dim.
    x = x_ref[0].astype(jnp.bfloat16)                      # (B, in) bf16 for MXU

    aux1 = aux1_ref[...]                                   # (3, H1) f32
    b1, g1, be1 = aux1[0:1, :], aux1[1:2, :], aux1[2:3, :]
    aux2 = aux2_ref[...]                                   # (3, H2) f32
    b2, g2, be2 = aux2[0:1, :], aux2[1:2, :], aux2[2:3, :]

    # Layer 1: Linear (bf16 x bf16 -> f32 acc) -> ReLU -> Dropout(identity) -> LayerNorm
    h1 = jnp.dot(x, w1_ref[...], preferred_element_type=jnp.float32) + b1
    h1 = jnp.maximum(h1, 0.0)
    # TODO(synk): Dropout(p=0.3) is identity here (eval mode); training-mode mask not implemented.
    h1 = _layernorm_f32(h1, g1, be1)

    # Layer 2
    h2 = jnp.dot(h1.astype(jnp.bfloat16), w2_ref[...],
                 preferred_element_type=jnp.float32) + b2
    h2 = jnp.maximum(h2, 0.0)
    h2 = _layernorm_f32(h2, g2, be2)

    # Fold batch-mean through the final affine layer (exactly equivalent to
    # mean(h2 @ w3 + b3, axis=0)); tanh applied after the mean as in the spec.
    h2_mean = jnp.mean(h2, axis=0, keepdims=True)          # (1, H2)
    out = jnp.dot(h2_mean.astype(jnp.bfloat16), w3_ref[...],
                  preferred_element_type=jnp.float32) + b3_ref[...]
    out = jnp.tanh(out)                                    # (1, n_sub)
    o_ref[...] = out.reshape(o_ref.shape)


def init_params(key, input_dim, num_subnetworks, hidden_dims=(256, 128)):
    """PyTorch-style Linear params (weights stored transposed: [in, out]), f32."""
    h1, h2 = hidden_dims
    ks = jax.random.split(key, 3)

    def lin(k, fan_in, fan_out):
        bound = 1.0 / jnp.sqrt(fan_in)
        kw, kb = jax.random.split(k)
        w = jax.random.uniform(kw, (fan_in, fan_out), jnp.float32, -bound, bound)
        b = jax.random.uniform(kb, (1, fan_out), jnp.float32, -bound, bound)
        return w, b

    w1, b1 = lin(ks[0], input_dim, h1)
    w2, b2 = lin(ks[1], h1, h2)
    w3, b3 = lin(ks[2], h2, num_subnetworks)
    g1, be1 = jnp.ones((1, h1), jnp.float32), jnp.zeros((1, h1), jnp.float32)
    g2, be2 = jnp.ones((1, h2), jnp.float32), jnp.zeros((1, h2), jnp.float32)
    return (w1, b1, g1, be1, w2, b2, g2, be2, w3, b3)


def pack_params(raw):
    """Pack to kernel operands: bf16 weights + one (3,H) f32 aux slab per layer."""
    (w1, b1, g1, be1, w2, b2, g2, be2, w3, b3) = raw
    aux1 = jnp.concatenate([b1, g1, be1], axis=0)          # (3, H1) f32
    aux2 = jnp.concatenate([b2, g2, be2], axis=0)          # (3, H2) f32
    return (w1.astype(jnp.bfloat16), aux1,
            w2.astype(jnp.bfloat16), aux2,
            w3.astype(jnp.bfloat16), b3)


def neuromodulator_forward(activations, packed):
    """activations: [B, input_dim] or [N, B, input_dim] f32.
    Returns [num_subnetworks] or [N, num_subnetworks] f32 (eval mode)."""
    squeeze = activations.ndim == 2
    if squeeze:
        activations = activations[None]
    N, B, in_dim = activations.shape
    w1, aux1, w2, aux2, w3, b3 = packed
    n_sub = w3.shape[1]

    keep2d = lambda n: (0, 0)   # weights / aux stay on the same block every step
    out = pl.pallas_call(
        neuromod_kernel,
        out_shape=jax.ShapeDtypeStruct((N, 1, n_sub), jnp.float32),
        grid=(N,),
        in_specs=[
            pl.BlockSpec((1, B, in_dim), lambda n: (n, 0, 0)),
            pl.BlockSpec(w1.shape, keep2d),
            pl.BlockSpec(aux1.shape, keep2d),
            pl.BlockSpec(w2.shape, keep2d),
            pl.BlockSpec(aux2.shape, keep2d),
            pl.BlockSpec(w3.shape, keep2d),
            pl.BlockSpec(b3.shape, keep2d),
        ],
        out_specs=pl.BlockSpec((1, 1, n_sub), lambda n: (n, 0, 0)),
        compiler_params=pltpu.CompilerParams(
            dimension_semantics=("parallel",)),
    )(activations, w1, aux1, w2, aux2, w3, b3)
    out = out.reshape(N, n_sub)
    return out[0] if squeeze else out


def _reference(x, packed):
    """Pure-JAX reference in original PyTorch op order (mean AFTER final Linear)."""
    w1, aux1, w2, aux2, w3, b3 = packed
    b1, g1, be1 = aux1[0:1], aux1[1:2], aux1[2:3]
    b2, g2, be2 = aux2[0:1], aux2[1:2], aux2[2:3]

    def ln(h, g, b, eps=1e-5):
        mu = jnp.mean(h, -1, keepdims=True)
        var = jnp.mean((h - mu) ** 2, -1, keepdims=True)
        return (h - mu) / jnp.sqrt(var + eps) * g + b

    def mm(a, w):
        return jnp.dot(a.astype(jnp.bfloat16), w,
                       preferred_element_type=jnp.float32)

    h1 = ln(jnp.maximum(mm(x, w1) + b1, 0.0), g1, be1)
    h2 = ln(jnp.maximum(mm(h1, w2) + b2, 0.0), g2, be2)
    out = mm(h2, w3) + b3
    return jnp.tanh(jnp.mean(out, axis=0))


if __name__ == "__main__":
    key = jax.random.PRNGKey(0)
    k_x, k_p = jax.random.split(key)

    B, input_dim, num_subnetworks = 8, 32, 4
    n_instances = 4

    raw_params = init_params(k_p, input_dim, num_subnetworks)
    packed = pack_params(raw_params)

    # Batched-instance path (amortizes launch/DMA cost; weights stay in VMEM).
    acts = jax.random.normal(k_x, (n_instances, B, input_dim), jnp.float32)
    dopamine = neuromodulator_forward(acts, packed)
    jax.block_until_ready(dopamine)
    assert dopamine.shape == (n_instances, num_subnetworks)

    # Single-instance path (same kernel, N=1 grid).
    d0 = neuromodulator_forward(acts[0], packed)
    jax.block_until_ready(d0)
    assert d0.shape == (num_subnetworks,)

    # Numerical check vs. pure-JAX reference (mean taken after the final
    # Linear, as in the PyTorch module) -- folding the mean is exact up to
    # bf16/f32 rounding.
    ref = jax.vmap(lambda a: _reference(a, packed))(acts)
    assert jnp.allclose(dopamine, ref, atol=2e-2, rtol=2e-2)
    assert bool(jnp.all(jnp.isfinite(dopamine)))

    print("KERNEL_OK")
</pallas_src>

<mosaic_0001>
module attributes {stable_mosaic.version = 11 : i64} {
  func.func @neuromod_kernel(%arg0: i32, %arg1: memref<1x8x32xf32, #tpu.memory_space<vmem>>, %arg2: memref<32x256xbf16, #tpu.memory_space<vmem>>, %arg3: memref<3x256xf32, #tpu.memory_space<vmem>>, %arg4: memref<256x128xbf16, #tpu.memory_space<vmem>>, %arg5: memref<3x128xf32, #tpu.memory_space<vmem>>, %arg6: memref<128x4xbf16, #tpu.memory_space<vmem>>, %arg7: memref<1x4xf32, #tpu.memory_space<vmem>>, %arg8: memref<1x1x4xf32, #tpu.memory_space<vmem>>) attributes {dimension_semantics = [#tpu.dimension_semantics<parallel>], iteration_bounds = array<i64: 4>, scalar_prefetch = 0 : i64, scratch_operands = 0 : i64, tpu.core_type = #tpu.core_type<tc>, window_params = [{transform_indices = @transform_0, window_bounds = array<i64: 1, 8, 32>}, {pipeline_mode = #tpu.pipeline_mode<synchronous>, transform_indices = @transform_1, window_bounds = array<i64: 32, 256>}, {pipeline_mode = #tpu.pipeline_mode<synchronous>, transform_indices = @transform_2, window_bounds = array<i64: 3, 256>}, {pipeline_mode = #tpu.pipeline_mode<synchronous>, transform_indices = @transform_3, window_bounds = array<i64: 256, 128>}, {pipeline_mode = #tpu.pipeline_mode<synchronous>, transform_indices = @transform_4, window_bounds = array<i64: 3, 128>}, {pipeline_mode = #tpu.pipeline_mode<synchronous>, transform_indices = @transform_5, window_bounds = array<i64: 128, 4>}, {pipeline_mode = #tpu.pipeline_mode<synchronous>, transform_indices = @transform_6, window_bounds = array<i64: 1, 4>}, {transform_indices = @transform_7, window_bounds = array<i64: 1, 1, 4>}]} {
    %c0 = arith.constant 0 : index
    %c0_0 = arith.constant 0 : index
    %c0_1 = arith.constant 0 : index
    %0 = vector.load %arg1[%c0, %c0_0, %c0_1] : memref<1x8x32xf32, #tpu.memory_space<vmem>>, vector<1x8x32xf32>
    %1 = vector.shape_cast %0 : vector<1x8x32xf32> to vector<8x32xf32>
    %2 = arith.truncf %1 : vector<8x32xf32> to vector<8x32xbf16>
    %c0_2 = arith.constant 0 : index
    %c0_3 = arith.constant 0 : index
    %3 = vector.load %arg3[%c0_2, %c0_3] : memref<3x256xf32, #tpu.memory_space<vmem>>, vector<3x256xf32>
    %4 = vector.extract_strided_slice %3 {offsets = [0, 0], sizes = [1, 256], strides = [1, 1]} : vector<3x256xf32> to vector<1x256xf32>
    %5 = vector.extract_strided_slice %3 {offsets = [1, 0], sizes = [1, 256], strides = [1, 1]} : vector<3x256xf32> to vector<1x256xf32>
    %6 = vector.extract_strided_slice %3 {offsets = [2, 0], sizes = [1, 256], strides = [1, 1]} : vector<3x256xf32> to vector<1x256xf32>
    %c0_4 = arith.constant 0 : index
    %c0_5 = arith.constant 0 : index
    %7 = vector.load %arg5[%c0_4, %c0_5] : memref<3x128xf32, #tpu.memory_space<vmem>>, vector<3x128xf32>
    %8 = vector.extract_strided_slice %7 {offsets = [0, 0], sizes = [1, 128], strides = [1, 1]} : vector<3x128xf32> to vector<1x128xf32>
    %9 = vector.extract_strided_slice %7 {offsets = [1, 0], sizes = [1, 128], strides = [1, 1]} : vector<3x128xf32> to vector<1x128xf32>
    %10 = vector.extract_strided_slice %7 {offsets = [2, 0], sizes = [1, 128], strides = [1, 1]} : vector<3x128xf32> to vector<1x128xf32>
    %c0_6 = arith.constant 0 : index
    %c0_7 = arith.constant 0 : index
    %11 = vector.load %arg2[%c0_6, %c0_7] : memref<32x256xbf16, #tpu.memory_space<vmem>>, vector<32x256xbf16>
    %cst = arith.constant dense<0.000000e+00> : vector<8x256xf32>
    %12 = tpu.matmul %2, %11, %cst {dimension_numbers = #tpu.dot_dimension_numbers<[1], [0], [0], [1], [0, 0, 1, 1], [], []>} : vector<8x32xbf16>, vector<32x256xbf16>, vector<8x256xf32> -> vector<8x256xf32>
    %13 = vector.broadcast %4 : vector<1x256xf32> to vector<8x256xf32>
    %14 = arith.addf %12, %13 : vector<8x256xf32>
    %cst_8 = arith.constant 0.000000e+00 : f32
    %15 = vector.broadcast %cst_8 : f32 to vector<8x256xf32>
    %16 = arith.maximumf %14, %15 : vector<8x256xf32>
    %cst_9 = arith.constant dense<0.000000e+00> : vector<8xf32>
    %17 = vector.multi_reduction <add>, %16, %cst_9 [1] : vector<8x256xf32> to vector<8xf32>
    %18 = vector.shape_cast %17 : vector<8xf32> to vector<8x1xf32>
    %cst_10 = arith.constant 2.560000e+02 : f32
    %19 = vector.broadcast %cst_10 : f32 to vector<8x1xf32>
    %20 = arith.divf %18, %19 : vector<8x1xf32>
    %21 = arith.mulf %16, %16 : vector<8x256xf32>
    %cst_11 = arith.constant dense<0.000000e+00> : vector<8xf32>
    %22 = vector.multi_reduction <add>, %21, %cst_11 [1] : vector<8x256xf32> to vector<8xf32>
    %23 = vector.shape_cast %22 : vector<8xf32> to vector<8x1xf32>
    %cst_12 = arith.constant 2.560000e+02 : f32
    %24 = vector.broadcast %cst_12 : f32 to vector<8x1xf32>
    %25 = arith.divf %23, %24 : vector<8x1xf32>
    %26 = arith.mulf %20, %20 : vector<8x1xf32>
    %27 = arith.subf %25, %26 : vector<8x1xf32>
    %28 = vector.broadcast %20 : vector<8x1xf32> to vector<8x256xf32>
    %29 = arith.subf %16, %28 : vector<8x256xf32>
    %cst_13 = arith.constant 9.99999974E-6 : f32
    %30 = vector.broadcast %cst_13 : f32 to vector<8x1xf32>
    %31 = arith.addf %27, %30 : vector<8x1xf32>
    %32 = math.rsqrt %31 : vector<8x1xf32>
    %33 = vector.broadcast %32 : vector<8x1xf32> to vector<8x256xf32>
    %34 = arith.mulf %29, %33 : vector<8x256xf32>
    %35 = vector.broadcast %5 : vector<1x256xf32> to vector<8x256xf32>
    %36 = arith.mulf %34, %35 : vector<8x256xf32>
    %37 = vector.broadcast %6 : vector<1x256xf32> to vector<8x256xf32>
    %38 = arith.addf %36, %37 : vector<8x256xf32>
    %39 = arith.truncf %38 : vector<8x256xf32> to vector<8x256xbf16>
    %c0_14 = arith.constant 0 : index
    %c0_15 = arith.constant 0 : index
    %40 = vector.load %arg4[%c0_14, %c0_15] : memref<256x128xbf16, #tpu.memory_space<vmem>>, vector<256x128xbf16>
    %cst_16 = arith.constant dense<0.000000e+00> : vector<8x128xf32>
    %41 = tpu.matmul %39, %40, %cst_16 {dimension_numbers = #tpu.dot_dimension_numbers<[1], [0], [0], [1], [0, 0, 1, 1], [], []>} : vector<8x256xbf16>, vector<256x128xbf16>, vector<8x128xf32> -> vector<8x128xf32>
    %42 = vector.broadcast %8 : vector<1x128xf32> to vector<8x128xf32>
    %43 = arith.addf %41, %42 : vector<8x128xf32>
    %cst_17 = arith.constant 0.000000e+00 : f32
    %44 = vector.broadcast %cst_17 : f32 to vector<8x128xf32>
    %45 = arith.maximumf %43, %44 : vector<8x128xf32>
    %cst_18 = arith.constant dense<0.000000e+00> : vector<8xf32>
    %46 = vector.multi_reduction <add>, %45, %cst_18 [1] : vector<8x128xf32> to vector<8xf32>
    %47 = vector.shape_cast %46 : vector<8xf32> to vector<8x1xf32>
    %cst_19 = arith.constant 1.280000e+02 : f32
    %48 = vector.broadcast %cst_19 : f32 to vector<8x1xf32>
    %49 = arith.divf %47, %48 : vector<8x1xf32>
    %50 = arith.mulf %45, %45 : vector<8x128xf32>
    %cst_20 = arith.constant dense<0.000000e+00> : vector<8xf32>
    %51 = vector.multi_reduction <add>, %50, %cst_20 [1] : vector<8x128xf32> to vector<8xf32>
    %52 = vector.shape_cast %51 : vector<8xf32> to vector<8x1xf32>
    %cst_21 = arith.constant 1.280000e+02 : f32
    %53 = vector.broadcast %cst_21 : f32 to vector<8x1xf32>
    %54 = arith.divf %52, %53 : vector<8x1xf32>
    %55 = arith.mulf %49, %49 : vector<8x1xf32>
    %56 = arith.subf %54, %55 : vector<8x1xf32>
    %57 = vector.broadcast %49 : vector<8x1xf32> to vector<8x128xf32>
    %58 = arith.subf %45, %57 : vector<8x128xf32>
    %cst_22 = arith.constant 9.99999974E-6 : f32
    %59 = vector.broadcast %cst_22 : f32 to vector<8x1xf32>
    %60 = arith.addf %56, %59 : vector<8x1xf32>
    %61 = math.rsqrt %60 : vector<8x1xf32>
    %62 = vector.broadcast %61 : vector<8x1xf32> to vector<8x128xf32>
    %63 = arith.mulf %58, %62 : vector<8x128xf32>
    %64 = vector.broadcast %9 : vector<1x128xf32> to vector<8x128xf32>
    %65 = arith.mulf %63, %64 : vector<8x128xf32>
    %66 = vector.broadcast %10 : vector<1x128xf32> to vector<8x128xf32>
    %67 = arith.addf %65, %66 : vector<8x128xf32>
    %cst_23 = arith.constant dense<0.000000e+00> : vector<128xf32>
    %68 = vector.multi_reduction <add>, %67, %cst_23 [0] : vector<8x128xf32> to vector<128xf32>
    %69 = vector.shape_cast %68 : vector<128xf32> to vector<1x128xf32>
    %cst_24 = arith.constant 8.000000e+00 : f32
    %70 = vector.broadcast %cst_24 : f32 to vector<1x128xf32>
    %71 = arith.divf %69, %70 : vector<1x128xf32>
    %72 = arith.truncf %71 : vector<1x128xf32> to vector<1x128xbf16>
    %c0_25 = arith.constant 0 : index
    %c0_26 = arith.constant 0 : index
    %73 = vector.load %arg6[%c0_25, %c0_26] : memref<128x4xbf16, #tpu.memory_space<vmem>>, vector<128x4xbf16>
    %cst_27 = arith.constant dense<0.000000e+00> : vector<1x4xf32>
    %74 = tpu.matmul %72, %73, %cst_27 {dimension_numbers = #tpu.dot_dimension_numbers<[1], [0], [0], [1], [0, 0, 1, 1], [], []>} : vector<1x128xbf16>, vector<128x4xbf16>, vector<1x4xf32> -> vector<1x4xf32>
    %c0_28 = arith.constant 0 : index
    %c0_29 = arith.constant 0 : index
    %75 = vector.load %arg7[%c0_28, %c0_29] : memref<1x4xf32, #tpu.memory_space<vmem>>, vector<1x4xf32>
    %76 = arith.addf %74, %75 : vector<1x4xf32>
    %77 = math.tanh %76 : vector<1x4xf32>
    %78 = vector.shape_cast %77 : vector<1x4xf32> to vector<1x1x4xf32>
    %c0_30 = arith.constant 0 : index
    %c0_31 = arith.constant 0 : index
    %c0_32 = arith.constant 0 : index
    %79 = vector.load %arg8[%c0_30, %c0_31, %c0_32] : memref<1x1x4xf32, #tpu.memory_space<vmem>>, vector<1x1x4xf32>
    tpu.vector_store %arg8[%c0_30, %c0_31, %c0_32], %78 {strides = array<i32>} : memref<1x1x4xf32, #tpu.memory_space<vmem>>, vector<1x1x4xf32>,
    return
  }
  func.func @transform_0(%arg0: i32) -> (i32, i32, i32) {
    %c0_i32 = arith.constant 0 : i32
    %c0_i32_0 = arith.constant 0 : i32
    %c0_i32_1 = arith.constant 0 : i32
    return %arg0, %c0_i32, %c0_i32_0 : i32, i32, i32
  }
  func.func @transform_1(%arg0: i32) -> (i32, i32) {
    %c0_i32 = arith.constant 0 : i32
    %c0_i32_0 = arith.constant 0 : i32
    %c0_i32_1 = arith.constant 0 : i32
    return %c0_i32, %c0_i32_0 : i32, i32
  }
  func.func @transform_2(%arg0: i32) -> (i32, i32) {
    %c0_i32 = arith.constant 0 : i32
    %c0_i32_0 = arith.constant 0 : i32
    %c0_i32_1 = arith.constant 0 : i32
    return %c0_i32, %c0_i32_0 : i32, i32
  }
  func.func @transform_3(%arg0: i32) -> (i32, i32) {
    %c0_i32 = arith.constant 0 : i32
    %c0_i32_0 = arith.constant 0 : i32
    %c0_i32_1 = arith.constant 0 : i32
    return %c0_i32, %c0_i32_0 : i32, i32
  }
  func.func @transform_4(%arg0: i32) -> (i32, i32) {
    %c0_i32 = arith.constant 0 : i32
    %c0_i32_0 = arith.constant 0 : i32
    %c0_i32_1 = arith.constant 0 : i32
    return %c0_i32, %c0_i32_0 : i32, i32
  }
  func.func @transform_5(%arg0: i32) -> (i32, i32) {
    %c0_i32 = arith.constant 0 : i32
    %c0_i32_0 = arith.constant 0 : i32
    %c0_i32_1 = arith.constant 0 : i32
    return %c0_i32, %c0_i32_0 : i32, i32
  }
  func.func @transform_6(%arg0: i32) -> (i32, i32) {
    %c0_i32 = arith.constant 0 : i32
    %c0_i32_0 = arith.constant 0 : i32
    %c0_i32_1 = arith.constant 0 : i32
    return %c0_i32, %c0_i32_0 : i32, i32
  }
  func.func @transform_7(%arg0: i32) -> (i32, i32, i32) {
    %c0_i32 = arith.constant 0 : i32
    %c0_i32_0 = arith.constant 0 : i32
    %c0_i32_1 = arith.constant 0 : i32
    return %arg0, %c0_i32, %c0_i32_0 : i32, i32, i32
  }
}

</mosaic_0001>

<bundles_post_ra>
// kernel: tpu_custom_call.1
= control target key start
LH: loop header
LB: loop body
LE: loop exit
PB: predicated region body
PF: predicated region fallthrough
CT: control target
= control target key end

     0   :  { %12 = vsyncpa [#allocation3], 0  ;;  %s1440_s0 = inlined_call_operand.vmem [shape: f32[4,8,32], index: 0, kind: input, shape index: {}]   ;;  %s1441_s1 = inlined_call_operand.vmem [shape: bf16[32,256], index: 1, kind: input, shape index: {}]   ;;  %s1442_s2 = inlined_call_operand.hbm [shape: f32[3,256], index: 2, kind: input, shape index: {}]   ;;  %s1443_s3 = inlined_call_operand.hbm [shape: bf16[256,128], index: 3, kind: input, shape index: {}]   ;;  %s1444_s4 = inlined_call_operand.vmem [shape: f32[3,128], index: 4, kind: input, shape index: {}]   ;;  %s1445_s5 = inlined_call_operand.vmem [shape: bf16[128,4], index: 5, kind: input, shape index: {}]   ;;  %s1446_s6 = inlined_call_operand.vmem [shape: f32[1,4], index: 6, kind: input, shape index: {}]   ;;  %s1447_s7 = inlined_call_operand.hbm [shape: f32[4,1,4], index: 7, kind: output, shape index: {}]  }
   0x1   :  { %13 = vsyncpa [#allocation6], 0 }
   0x2   :  { %14 = vsyncpa [#allocation4], 0 }
   0x3   :  { %16 = vsyncpa [#allocation4 + $0x1], 0  ;;  %s1224_s24 = smov 0   ;;  %s1226_s25 = smov 0  }
   0x4   :  { %s1228_s26 = smov 0   ;;  %s1230_s27 = smov 0  }
   0x5 LB: > { %s1245_s28 = sadd.s32 4294967295, %s1174_s27   ;;  %s861_s29 = sadd.s32 4294967294, %s1174_s27   ;;  %s1174_s27 = sphi %s1230_s27, %s1465_s27   ;;  %s1170_s26 = sphi %s1228_s26, %s1464_s26   ;;  %s1166_s25 = sphi %s1226_s25, %s1463_s25   ;;  %s1162_s24 = sphi %s1224_s24, %s1462_s24  }
   0x6   : > { %s1249_s30 = sadd.s32 1, %s1174_s27   ;;  %s181_s8 = sadd.s32 1, %s1170_s26 }
   0x7   : > { %s178_s9 = ssub.s32 %s1174_s27, %s1249_s30  ;;  %p191_p0 = scmp.ne.s32.totalorder %s1170_s26, %s1166_s25 }
   0x8   : > { %p179_p1 = scmp.eq.s32.totalorder %s178_s9, 0  ;;  %p192_p2 = scmp.eq.s32.totalorder %s1245_s28, 3 }
   0x9   : > { %p197_p3 = scmp.ne.s32.totalorder %s1166_s25, %s1162_s24  ;;  %p198_p4 = scmp.eq.s32.totalorder %s861_s29, 3 }
   0xa   : > { %s1260_s10 = scalar_select %p179_p1, %s1170_s26, %s181_s8  }
   0xb   : > { %p1262_p5 = por %p192_p2, %p191_p0  ;;  %p1266_p6 = por %p198_p4, %p197_p3 }
   0xc   : > { %p862_p7 = scmp.ge.s32.totalorder %s1174_s27, 1  ;;  %p205_p8 = scmp.lt.s32.totalorder %s1174_s27, 5 }
   0xd   : > { %s1451_s11 = scalar_select %p1262_p5, 1, 0 }
   0xe   : > { %s1452_s12 = scalar_select %p1266_p6, 1, 0 }
   0xf   : > { %p1448_p9 = scmp.eq.s32.totalorder %s1245_s28, 0  ;;  %p1273_p10 = pnand %p862_p7, %p205_p8 }
  0x10   : > { %s1176_s14 = smov [#allocation2]   ;;  %s1177_s16 = smov [#allocation5]  }
  0x11   : > { %s1453_s13 = scalar_select %p1273_p10, 1, 0 }
  0x12   : > { %s221_s15 = sshll.u32 %s1176_s14, 4  ;;  %p963_p11 = pneg %p1273_p10  ;;  %s222_s15 = int_to_ptr.vmem [resolvable:$true] %s221_s15 }
  0x13   : > { %s231_s17 = sshll.u32 %s1177_s16, 4  ;;  %s1065_s19 = scalar_lea.vmem %s222_s15, 128  ;;  %s232_s17 = int_to_ptr.vmem [resolvable:$true] %s231_s17 }
  0x14   : > { %p1281_p12 = pnand %p1448_p9, %p963_p11  ;;  %p1066_p0 = scmp.ne.s32.totalorder %s222_s15, %s1065_s19 }
  0x15   : > { %p1073_p3 = scmp.lt.s32.totalorder %s222_s15, %s222_s15  ;;  %p1074_p4 = scmp.lt.s32.totalorder %s1065_s19, %s1065_s19 }
  0x16   : > { %p1056_p13 = pneg %p1281_p12 }
  0x17   : > { %p1075_p7 = por %p1074_p4, %p1073_p3 }
  0x18   : > { %p1068_p1 = pnand %p1066_p0, %p1056_p13 }
  0x1a   : > { %p1069_p2 = pneg %p1068_p1 }
  0x1c   : > { %p1076_p8 = pnand %p1075_p7, %p1069_p2 }
  0x1e   : > { %1079 = shalt.err (!%p1076_p8)
}
  0x1f   : > { %966 = dma.hbm_to_vmem [thread:$0]  (!%p1281_p12), %s1442_s2, 128, %s222_s15, [#allocation3]  }
  0x20   : > { %s1091_s22 = scalar_lea.vmem %s232_s17, 2048  ;;  %p1099_p0 = scmp.lt.s32.totalorder %s232_s17, %s232_s17 }
  0x21   : > { %p1092_p11 = scmp.ne.s32.totalorder %s232_s17, %s1091_s22  ;;  %p1100_p1 = scmp.lt.s32.totalorder %s1091_s22, %s1091_s22 }
  0x23   : > { %p1094_p9 = pnand %p1092_p11, %p1056_p13  ;;  %p1101_p5 = por %p1100_p1, %p1099_p0 }
  0x25   : > { %p1095_p6 = pneg %p1094_p9 }
  0x27   : > { %p1102_p10 = pnand %p1101_p5, %p1095_p6 }
  0x29   : > { %1105 = shalt.err (!%p1102_p10)
}
  0x2a   : > { %s1178_s23 = smov 64   ;;  %s1179_s29 = smov 4  }
  0x2b   : > { %969 = dma.hbm_to_vmem [thread:$0]  (!%p1281_p12), %s1443_s3, 2048, %s232_s17, [#allocation6], %s1178_s23, %s1178_s23, %s1179_s29  }
  0x2c   : > { %p1455_p2 = scmp.ne.s32.totalorder %s1453_s13, 0 }
  0x2d   : > { %p1456_p3 = scmp.eq.s32.totalorder (!%p1455_p2), %s1245_s28, 0 }
  0x2e   : > { %263 = sbr.rel (%p1455_p2) target bundleno = 1043 (0x413), region = 48 }
  0x33   : > { %1149 = dma.done.wait (%p1456_p3), [#allocation3], 128   ;;  %p1457_p9 = pmov %p1456_p3 }
  0x34   : > { %p1458_p5 = pmov %p1456_p3 }
  0x35   : > { %1151 = vsyncadd (%p1457_p9), [#allocation3], 4294967168 }
  0x36   : > { %1153 = dma.done.wait (%p1458_p5), [#allocation6], 2048   ;;  %p1459_p6 = pmov %p1456_p3 }
  0x37   : > { %p297_p10 = scmp.lt.s32.totalorder %s1245_s28, 3  ;;  %v1180_v0 = vmov 0   ;;  %v1018_v1 = vld [vmem:[%s1441_s1 + $0x14] ss:$8 sps:$4 sm:$0xff]   ;;  %v1020_v2 = vld [vmem:[%s1441_s1 + $0x10] ss:$8 sps:$4 sm:$0xff]   ;;  %v311_v7 = vlaneseq }
  0x38   : > { %1155 = vsyncadd (%p1459_p6), [#allocation6], 4294965248  ;;  %385 = vmatprep.mubr.bf16.mxu0 %v1180_v0  ;;  %365 = vmatprep.subr.bf16.mxu0 %v1018_v1  ;;  %v1021_v3 = vld [vmem:[%s1441_s1 + $0x4] ss:$8 sps:$4 sm:$0xff]   ;;  %v1023_v4 = vld [vmem:[%s1441_s1] ss:$8 sps:$4 sm:$0xff]  }
  0x39   : > { %s298_s14 = scalar_select %p297_p10, %s1245_s28, 3  ;;  %366 = vmatpush1.bf16.msra.mxu0 %v1020_v2  ;;  %vm349_vm0 = vcmask 261120   ;;  %v1330_v8 = vshrl.u32 %v311_v7, 7  ;;  %v1335_v10 = vld [vmem:[#allocation2] sm:$0x77]  ;;  %v1026_v30 = vld [vmem:[#allocation5 + $0x70] sm:$0xff]  }
  0x3a   : > { %367 = vmatprep.subr.bf16.mxu0 %v1021_v3  ;;  %v1024_v28 = vld [vmem:[#allocation5 + $0x78] sm:$0xff]   ;;  %v1027_v31 = vld [vmem:[#allocation5 + $0x30] sm:$0xff]   ;;  %v1028_v32 = vld [vmem:[#allocation5 + $0x68] sm:$0xff]   ;;  %vm1182_vm1 = vmmov 0   ;;  %s295_s18 = sand.u32 1, %s1166_s25   ;;  %vm769_vm2 = vcmask 24576  }
  0x3b   : > { %s869_s13 = sshll.u32 %s298_s14, 3  ;;  %v1333_v9 = vsub.s32 0, %v1330_v8  ;;  %v317_v11 = vsub.s32 4, %v1330_v8  ;;  %v1025_v29 = vld [vmem:[#allocation5 + $0x38] sm:$0xff]   ;;  %902 = vmatprep.subr.bf16.mxu1 %v1024_v28  ;;  %v1029_v33 = vld [vmem:[#allocation5 + $0x28] sm:$0xff]   ;;  %v1030_v34 = vld [vmem:[#allocation5 + $0x60] sm:$0xff]  }
  0x3c   : > { %s300_s19 = scalar_lea.vmem %s1440_s0, %s869_s13  ;;  %903 = vmatpush3.bf16.msra.mxu1 %v1025_v29  ;;  %v1031_v35 = vld [vmem:[#allocation5 + $0x20] sm:$0xff]   ;;  %v1032_v36 = vld [vmem:[#allocation5 + $0x58] sm:$0xff]   ;;  %v1034_v38 = vld [vmem:[#allocation5 + $0x50] sm:$0xff]   ;;  %v1349_v51 = vsub.s32 1, %v1330_v8  ;;  %v421_v52 = vsub.s32 5, %v1330_v8  ;;  %v1353_v53 = vsub.s32 2, %v1330_v8 }
  0x3d   : > { %v302_v5 = vld [vmem:[%s300_s19] sm:$0xff]  ;;  %368 = vmatpush1.bf16.msra.mxu0 %v1023_v4  ;;  %v314_v12 = vrot.slane %v1335_v10, %v1333_v9  ;;  %v318_v13 = vrot.slane %v1335_v10, %v317_v11  ;;  %904 = vmatprep.subr.bf16.mxu1 %v1026_v30  ;;  %v1035_v39 = vld [vmem:[#allocation5 + $0x10] sm:$0xff]   ;;  %v1036_v40 = vld [vmem:[#allocation5 + $0x48] sm:$0xff]   ;;  %v441_v54 = vsub.s32 6, %v1330_v8  ;;  %s899_s19 = sshll.u32 %s1245_s28, 4  ;;  %s296_s20 = scalar_lea.vmem [#allocation7], %s295_s18 }
  0x3e   : > { %v303_v6 = vpack.c.bf16 %v302_v5, %v302_v5  ;;  %v1033_v37 = vld [vmem:[#allocation5 + $0x18] sm:$0xff]   ;;  %v1037_v41 = vld [vmem:[#allocation5 + $0x8] sm:$0xff]   ;;  %v1038_v42 = vld [vmem:[#allocation5 + $0x40] sm:$0xff]   ;;  %v422_v55 = vrot.slane %v1335_v10, %v421_v52  ;;  %v418_v56 = vrot.slane %v1335_v10, %v1349_v51  ;;  %v438_v58 = vrot.slane %v1335_v10, %v1353_v53  ;;  %s784_s21 = sshll.u32 %s296_s20, 4  ;;  %s1405_s29 = scalar_lea.hbm %s1447_s7, %s899_s19  ;;  %s785_s21 = int_to_ptr.vmem [resolvable:$true] %s784_s21 }
  0x3f   : > { %v324_v14 = vrot.slane %v314_v12, %v1333_v9  ;;  %v328_v15 = vrot.slane %v318_v13, %v1333_v9  ;;  %v1039_v43 = vld [vmem:[#allocation5] sm:$0xff]   ;;  %v442_v57 = vrot.slane %v1335_v10, %v441_v54  ;;  %v305_v11 = vld [vmem:[%s1444_s4] sm:$0x7]  ;;  %s772_s8 = scalar_lea.sflag [#allocation4], %s295_s18  ;;  %s1106_s9 = scalar_lea.vmem %s785_s21, 16 }
  0x40   : > { %874 = vmatmul.mubr.msk.bf16.vlgmr.msra.gmra.mxu0 %vm349_vm0, %v303_v6  ;;  %905 = vmatpush3.bf16.msra.mxu1 %v1027_v31  ;;  %v432_v61 = vrot.slane %v422_v55, %v1349_v51  ;;  %v428_v62 = vrot.slane %v418_v56, %v1349_v51  ;;  %v448_v3 = vrot.slane %v438_v58, %v1353_v53  ;;  %v1047_v28 = vld [vmem:[%s1445_s5] sm:$0xff]   ;;  %p1107_p12 = scmp.ne.s32.totalorder %s785_s21, %s1106_s9  ;;  %p1460_p13 = scmp.ne.s32.totalorder %s1451_s11, 0 }
  0x41   : > { %906 = vmatprep.subr.bf16.mxu1 %v1028_v32  ;;  %v452_v1 = vrot.slane %v442_v57, %v1353_v53  ;;  %v492_v13 = vrot.slane %v305_v11, %v1333_v9  ;;  %v1041_v9 = vld [vmem:[%s1445_s5 + $0x30] sm:$0xff]   ;;  %s1183_s14 = smov [#allocation7]  }
  0x42   : > { %p1108_p4 = pnand %p1107_p12, %p1460_p13  ;;  %s1110_s13 = sshll.u32 %s1183_s14, 4  ;;  %s1111_s13 = int_to_ptr.vmem [resolvable:$false] %s1110_s13 }
  0x43   : > { %s1112_s28 = scalar_lea.vmem %s1111_s13, 32  ;;  %p1113_p8 = scmp.lt.s32.totalorder %s785_s21, %s1111_s13 }
  0x44   : > { %907 = vmatpush3.bf16.msra.mxu1 %v1029_v33  ;;  %p1109_p7 = pneg %p1108_p4  ;;  %p1114_p11 = scmp.lt.s32.totalorder %s1112_s28, %s1106_s9 }
  0x45   : > { %908 = vmatprep.subr.bf16.mxu1 %v1030_v34 }
  0x46   : > { %p1115_p0 = por %p1114_p11, %p1113_p8 }
  0x48   : > { %909 = vmatpush3.bf16.msra.mxu1 %v1031_v35  ;;  %p1116_p1 = pnand %p1115_p0, %p1109_p7 }
  0x49   : > { %910 = vmatprep.subr.bf16.mxu1 %v1032_v36  ;;  %v647_v36 = vrot.slane %v305_v11, %v1349_v51  ;;  %v679_v51 = vld [vmem:[%s1446_s6] sm:$0x1] }
  0x4c   : > { %911 = vmatpush3.bf16.msra.mxu1 %v1033_v37 }
  0x4d   : > { %912 = vmatprep.subr.bf16.mxu1 %v1034_v38 }
  0x50   : > { %913 = vmatpush3.bf16.msra.mxu1 %v1035_v39  ;;  %v652_v39 = vrot.slane %v305_v11, %v1353_v53 }
  0x51   : > { %914 = vmatprep.subr.bf16.mxu1 %v1036_v40 }
  0x54   : > { %915 = vmatpush3.bf16.msra.mxu1 %v1037_v41 }
  0x55   : > { %916 = vmatprep.subr.bf16.mxu1 %v1038_v42 }
  0x58   : > { %917 = vmatpush3.bf16.msra.mxu1 %v1039_v43 }
 0x100   : > { %v387_v16 = vpop.f32.mrf.mxu0 }
 0x101   : > { %v388_v17 = vadd.f32 %v387_v16, %v324_v14 }
 0x102   : > { %v389_v18 = vpop.f32.mrf.mxu0 }
 0x103   : > { %v390_v19 = vadd.f32 %v389_v18, %v328_v15  ;;  %v1343_v21 = vmax.f32 %v388_v17, 0.0 }
 0x104   : > { %v391_v20 = vpop.f32.mrf.mxu0 }
 0x105   : > { %v395_v22 = vmax.f32 %v390_v19, 0.0  ;;  %v401_v26 = vmul.f32 %v1343_v21, %v1343_v21 }
 0x106   : > { %v392_v23 = vpop.f32.mrf.mxu0 }
 0x107   : > { %v396_v24 = vadd.f32 %v395_v22, %v1343_v21  ;;  %v402_v25 = vmul.f32 %v395_v22, %v395_v22  ;;  %v1042_v23 = vld [vmem:[%s1445_s5 + $0x28] sm:$0xff]  }
 0x109   : > { %397 = vadd.xlane.f32.xlu0 %v396_v24  ;;  %v403_v27 = vadd.f32 %v402_v25, %v401_v26  ;;  %v1043_v24 = vld [vmem:[%s1445_s5 + $0x20] sm:$0xff]   ;;  %v1044_v25 = vld [vmem:[%s1445_s5 + $0x18] sm:$0xff]   ;;  %v1045_v26 = vld [vmem:[%s1445_s5 + $0x10] sm:$0xff]  }
 0x10d   : > { %404 = vadd.xlane.f32.xlu0 %v403_v27  ;;  %v1046_v27 = vld [vmem:[%s1445_s5 + $0x8] sm:$0xff]  }
 0x192   : > { %v398_v44 = vpop.xlane.xlu0 %397 }
 0x193   : > { %v400_v45 = vmul.f32 0.00390625, %v398_v44 }
 0x195   : > { %v407_v47 = vmul.f32 %v400_v45, %v400_v45  ;;  %v409_v59 = vsub.f32 %v1343_v21, %v400_v45  ;;  %v410_v60 = vsub.f32 %v395_v22, %v400_v45  ;;  %v1040_v21 = vld [vmem:[%s1445_s5 + $0x38] sm:$0xff]   ;;  %v1181_v22 = vmov 0.0  }
 0x196   : > { %v405_v46 = vpop.xlane.xlu0 %404  ;;  %933 = vmatprep.subr.bf16.mxu0 %v1181_v22  ;;  %949 = vmatprep.mubr.msk.bf16.mxu0 %vm1182_vm1, %v1181_v22 }
 0x197   : > { %v406_v48 = vmul.f32 0.00390625, %v405_v46  ;;  %934 = vmatpush3.bf16.msra.mxu0 %v1040_v21 }
 0x198   : > { %935 = vmatprep.subr.bf16.mxu0 %v1181_v22 }
 0x199   : > { %v408_v49 = vsub.f32 %v406_v48, %v407_v47 }
 0x19b   : > { %v411_v50 = vadd.f32 1e-05, %v408_v49  ;;  %936 = vmatpush3.bf16.msra.mxu0 %v1041_v9 }
 0x19c   : > { %937 = vmatprep.subr.bf16.mxu0 %v1181_v22 }
 0x19d   : > { %1048 = vrsqrt.f32 %v411_v50 }
 0x19f   : > { %938 = vmatpush3.bf16.msra.mxu0 %v1042_v23 }
 0x1a0   : > { %939 = vmatprep.subr.bf16.mxu0 %v1181_v22 }
 0x1a3   : > { %940 = vmatpush3.bf16.msra.mxu0 %v1043_v24 }
 0x1a4   : > { %941 = vmatprep.subr.bf16.mxu0 %v1181_v22 }
 0x1a7   : > { %942 = vmatpush3.bf16.msra.mxu0 %v1044_v25 }
 0x1a8   : > { %943 = vmatprep.subr.bf16.mxu0 %v1181_v22 }
 0x1aa   : > { %v1049_v63 = vpop.eup %1048 }
 0x1ab   : > { %v414_v0 = vmul.f32 %v1049_v63, %v410_v60  ;;  %v413_v2 = vmul.f32 %v1049_v63, %v409_v59  ;;  %944 = vmatpush3.bf16.msra.mxu0 %v1045_v26 }
 0x1ac   : > { %945 = vmatprep.subr.bf16.mxu0 %v1181_v22 }
 0x1ad   : > { %v434_v4 = vmul.f32 %v432_v61, %v414_v0  ;;  %v433_v5 = vmul.f32 %v428_v62, %v413_v2 }
 0x1af   : > { %v454_v6 = vadd.f32 %v452_v1, %v434_v4  ;;  %v453_v7 = vadd.f32 %v448_v3, %v433_v5  ;;  %946 = vmatpush3.bf16.msra.mxu0 %v1046_v27 }
 0x1b0   : > { %947 = vmatprep.subr.bf16.mxu0 %v1181_v22 }
 0x1b1   : > { %v456_v8 = vpack.c.bf16 %v454_v6, %v454_v6  ;;  %v455_v10 = vpack.c.bf16 %v453_v7, %v453_v7 }
 0x1b3   : > { %621 = vmatprep.mubr.bf16.mxu1 %v456_v8  ;;  %948 = vmatpush3.bf16.msra.mxu0 %v1047_v28 }
 0x1b4   : > { %622 = vmatmul.mubr.bf16.vlgmr.msra.gmra.mxu1 %v455_v10 }
 0x274   : > { %v918_v12 = vpop.f32.mrf.mxu1 }
 0x276   : > { %v919_v14 = vpop.f32.mrf.mxu1 }
 0x277   : > { %v920_v15 = vadd.f32 %v919_v14, %v918_v12 }
 0x278   : > { %v921_v16 = vpop.f32.mrf.mxu1 }
 0x279   : > { %v624_v17 = vadd.f32 %v920_v15, %v492_v13 }
 0x27a   : > { %v922_v18 = vpop.f32.mrf.mxu1 }
 0x27b   : > { %v629_v19 = vmax.f32 %v624_v17, 0.0 }
 0x27d   : > { %630 = vadd.xlane.f32.xlu1 %v629_v19  ;;  %v634_v20 = vmul.f32 %v629_v19, %v629_v19 }
 0x281   : > { %635 = vadd.xlane.f32.xlu1 %v634_v20 }
 0x306   : > { %v631_v29 = vpop.xlane.xlu1 %630 }
 0x307   : > { %v633_v30 = vmul.f32 0.0078125, %v631_v29 }
 0x309   : > { %v638_v32 = vmul.f32 %v633_v30, %v633_v30  ;;  %v640_v37 = vsub.f32 %v629_v19, %v633_v30 }
 0x30a   : > { %v636_v31 = vpop.xlane.xlu1 %635 }
 0x30b   : > { %v637_v33 = vmul.f32 0.0078125, %v636_v31 }
 0x30d   : > { %v639_v34 = vsub.f32 %v637_v33, %v638_v32 }
 0x30f   : > { %v641_v35 = vadd.f32 1e-05, %v639_v34 }
 0x311   : > { %1050 = vrsqrt.f32 %v641_v35 }
 0x31e   : > { %v1051_v38 = vpop.eup %1050 }
 0x31f   : > { %v643_v40 = vmul.f32 %v1051_v38, %v640_v37 }
 0x321   : > { %v648_v41 = vmul.f32 %v647_v36, %v643_v40 }
 0x323   : > { %v653_v42 = vadd.f32 %v652_v39, %v648_v41 }
 0x325   : > { %v654_v43 = vrot.slane %v653_v42, 4 }
 0x327   : > { %v655_v44 = vadd.f32 %v654_v43, %v653_v42 }
 0x329   : > { %v656_v45 = vrot.slane %v655_v44, 2 }
 0x32b   : > { %v657_v46 = vadd.f32 %v656_v45, %v655_v44 }
 0x32d   : > { %v658_v47 = vrot.slane %v657_v46, 1 }
 0x32f   : > { %v659_v48 = vadd.f32 %v658_v47, %v657_v46 }
 0x331   : > { %v661_v49 = vmul.f32 0.125, %v659_v48 }
 0x333   : > { %v662_v50 = vpack.c.bf16 %v661_v49, %v661_v49 }
 0x335   : > { %950 = vmatmul.mubr.bf16.vlgmr.msra.gmra.mxu0 %v662_v50 }
 0x3f5   : > { %v762_v52 = vpop.f32.mrf.mxu0 }
 0x3f6   : > { %v763_v53 = vadd.f32 %v762_v52, %v679_v51 }
 0x3f7   : > { %v951_v54 = vpop.f32.mrf.mxu0 }
 0x3f8   : > { %1052 = vtanh.f32 %v763_v53 }
 0x3f9   : > { %v765_v55 = vpop.f32.mrf.mxu0 }
 0x3fb   : > { %v952_v56 = vpop.f32.mrf.mxu0 }
 0x405   : > { %v1053_v57 = vpop.eup %1052 }
 0x406   : > { %770 = vst.msk [vmem:[%s296_s20] sm:$0x1] %vm769_vm2, %v1053_v57 }
 0x407   : > { %1119 = shalt.err (!%p1116_p1)
}
 0x408   : > { %s1120_s15 = scalar_lea.hbm %s1405_s29, 16  ;;  %s1124_s18 = scalar_lea.hbm %s1447_s7, 64 }
 0x409   : > { %p1121_p2 = scmp.ne.s32.totalorder %s1405_s29, %s1120_s15  ;;  %p1125_p5 = scmp.lt.s32.totalorder %s1405_s29, %s1447_s7 }
 0x40a   : > { %p1126_p6 = scmp.lt.s32.totalorder %s1124_s18, %s1120_s15 }
 0x40b   : > { %p1122_p3 = pnand %p1121_p2, %p1460_p13 }
 0x40c   : > { %p1127_p10 = por %p1126_p6, %p1125_p5 }
 0x40d   : > { %p1123_p9 = pneg %p1122_p3 }
 0x40f   : > { %p1128_p12 = pnand %p1127_p10, %p1123_p9 }
 0x411   : > { %1131 = shalt.err (!%p1128_p12)
}
 0x412   : > { %961 = dma.vmem_to_hbm [thread:$0]  (%p1460_p13), %s785_s21, 16, %s1405_s29, %s772_s8  }
 0x413 PF: > { %p978_p4 = scmp.ge.s32.totalorder %s1174_s27, 2  ;;  %s796_s22 = sand.u32 1, %s1162_s24  }
 0x414   : > { %p1461_p7 = scmp.ne.s32.totalorder %s1452_s12, 0  ;;  %s797_s23 = scalar_lea.sflag [#allocation4], %s796_s22 }
 0x416   : > { %p971_p8 = pnand %p978_p4, %p1461_p7 }
 0x418   : > { %p972_p11 = pneg %p971_p8 }
 0x41a   : > { %1157 = dma.done.wait (%p972_p11), %s797_s23, 16  }
 0x41b   : > { %1159 = vsyncadd (%p972_p11), %s797_s23, 4294967280  ;;  %p19_p0 = scmp.ge.s32.totalorder %s1249_s30, 6   ;;  %s1462_s24 = smov %s1166_s25 }
 0x41c   : > { %s1463_s25 = smov %s1170_s26  ;;  %s1464_s26 = smov %s1260_s10 }
 0x41d   : > { %s1465_s27 = smov %s1249_s30  ;;  %21 = sbr.rel (!%p19_p0) target bundleno = 5 (0x5), region = 92 }
 0x422   :  { %801 = vsyncpa [#allocation3], 1 }
 0x423   :  { %803 = vsyncpa [#allocation3 + $0x1], 1 }
 0x424   :  { %804 = vsyncpa [#allocation6], 1 }
 0x425   :  { %805 = vsyncpa [#allocation4], 1 }
 0x426   :  { %807 = vsyncpa [#allocation4 + $0x1], 1 }

</bundles_post_ra>
